<compile_context>
chip_gen: v7x
topology: tpu7x:2x2x1
jax: 0.10.0
libtpu: 0.0.40
codegen_flags: <defaults>
</compile_context>

<pallas_src>
import functools

import numpy as np

import jax
import jax.numpy as jnp
from jax import lax
from jax.experimental import pallas as pl
from jax.experimental.pallas import tpu as pltpu


def _resblock_kernel(x_ref, c_ref, w1_ref, w2_ref, o_ref, *, shifts, km):
    # x_ref : (1, Cp, L)      L = B*HW, B images lane-concatenated, Cp % 8 == 0
    # c_ref : (km+8, L)       rows [0, km): per-tap boundary masks (f32 0/1),
    #                         row km: ones (bias row), rows km+1..: zeros
    # w*_ref: (Cp, km+8)      cols [0, km): conv weights (tap-major, in-ch minor),
    #                         col km: bias, rest zero
    # o_ref : (1, Cp, L)
    x = x_ref[0].astype(jnp.float32)               # (Cp, L)
    c = c_ref[...]                                 # (km+8, L) compile-time constants
    mask = c[:km]                                  # (9*Cp, L)
    aug = c[km:]                                   # (8, L): [ones; zeros]

    def conv3x3(img, w_ref):
        # im2col: 9 shifted taps via XLU rolls, zero-pad boundaries via ONE
        # pre-broadcast constant multiply, bias via the appended ones row,
        # then a single MXU matmul.
        taps = [img if s == 0 else pltpu.roll(img, shift=s, axis=1) for s in shifts]
        patches = jnp.concatenate(taps, axis=0) * mask          # (9*Cp, L)
        patches = jnp.concatenate([patches, aug], axis=0)       # (9*Cp+8, L)
        return jnp.dot(w_ref[...], patches,
                       preferred_element_type=jnp.float32)      # (Cp, L)

    y = conv3x3(x, w1_ref)
    # exact (erf) GELU — matches nn.GELU default; GELU(0)=0 keeps pad rows zero
    y = 0.5 * y * (1.0 + lax.erf(y * jnp.float32(0.7071067811865476)))
    y = conv3x3(y, w2_ref)
    # residual add; full-tile (sublane-aligned) lane-dense store — pad rows are 0
    o_ref[0] = (y + x).astype(o_ref.dtype)


def _round_up(v, m):
    return (v + m - 1) // m * m


def pack_resblock_params(w1, b1, w2, b2):
    """One-time repack of ResBlock conv params (HWIO) into the kernel layout.

    Returns (w1r, w2r), each (Cp, 9*Cp + 8):
      cols [0, 9*Cp): weights, column = (tap*Cp + in_channel), row = out_channel
      col 9*Cp      : bias
      remaining cols: zero (sublane-alignment padding of the contraction dim)
    Call once per parameter set (hoisted off the per-forward hot path).
    """
    w1 = np.asarray(w1, np.float32)
    w2 = np.asarray(w2, np.float32)
    b1 = np.asarray(b1, np.float32)
    b2 = np.asarray(b2, np.float32)
    cin, cout = w1.shape[2], w1.shape[3]
    if cin != cout:
        raise ValueError("ResBlock residual add requires in_channel == out_channel")
    cp = _round_up(max(cin, cout), 8)

    def pack(w, b, c_in):
        wm = np.zeros((cp, 3, 3, cp), np.float32)
        wm[:cout, :, :, :c_in] = np.transpose(w, (3, 0, 1, 2))
        wm = wm.reshape(cp, 9 * cp)
        extra = np.zeros((cp, 8), np.float32)
        extra[:cout, 0] = b
        return jnp.asarray(np.concatenate([wm, extra], axis=1))

    return pack(w1, b1, cin), pack(w2, b2, cout)


@jax.jit
def resblock_forward(x_nchw, w1r, w2r):
    """x_nchw: (N, Cin, H, W); w1r/w2r: pre-packed params from pack_resblock_params."""
    N, Cin, H, W = x_nchw.shape
    Cout = Cin                      # residual add requires in_channel == out_channel
    Cp = w1r.shape[0]
    HW = H * W
    km = 9 * Cp

    # Grid / per-step batching: keep >= 2 parallel steps so both v7x TensorCores
    # get work; amortize the ~0.35us per-step overhead by lane-concatenating
    # B = ceil(N / G) images into one (Cp, B*HW) slab per step.
    G = 2 if N >= 2 else 1
    B = -(-N // G)
    Npad = G * B
    L = B * HW

    x_flat = x_nchw.reshape(N, Cin, HW)
    if Npad != N or Cp != Cin:      # no-op whenever N % G == 0 and C % 8 == 0
        x_flat = jnp.pad(x_flat, ((0, Npad - N), (0, Cp - Cin), (0, 0)))
    # lane-concat layout: (G, Cp, B*HW) — batch*spatial on the 128-lane axis.
    x_lane = x_flat.reshape(G, B, Cp, HW).transpose(0, 2, 1, 3).reshape(G, Cp, L)

    # Compile-time constants (numpy -> baked into the program, zero per-call cost):
    # per-tap zero-padding boundary masks, tiled per HW period so taps never leak
    # across image boundaries, plus a ones row that folds the conv bias into the
    # matmul. Shifts are taken mod L (= B*HW).
    pos = np.arange(HW)
    hh, wwi = pos // W, pos % W
    ones = np.ones(HW, bool)
    row_m = (hh >= 1, ones, hh <= H - 2)          # dy = 0, 1, 2
    col_m = (wwi >= 1, ones, wwi <= W - 2)        # dx = 0, 1, 2
    masks, shifts = [], []
    for dy in range(3):
        for dx in range(3):
            masks.append(row_m[dy] & col_m[dx])
            shifts.append((-((dy - 1) * W + (dx - 1))) % L)
    m9 = np.tile(np.stack(masks).astype(np.float32), (1, B))     # (9, L)
    mfull = np.repeat(m9, Cp, axis=0)                            # (9*Cp, L)
    aug = np.zeros((8, L), np.float32)
    aug[0, :] = 1.0                                              # bias row
    cmat = jnp.asarray(np.concatenate([mfull, aug], axis=0))     # (9*Cp+8, L)

    kernel = functools.partial(_resblock_kernel, shifts=tuple(shifts), km=km)

    out = pl.pallas_call(
        kernel,
        out_shape=jax.ShapeDtypeStruct((G, Cp, L), x_nchw.dtype),
        grid_spec=pltpu.PrefetchScalarGridSpec(
            num_scalar_prefetch=0,
            grid=(G,),
            in_specs=[
                pl.BlockSpec((1, Cp, L), lambda g: (g, 0, 0)),
                pl.BlockSpec((km + 8, L), lambda g: (0, 0)),      # constants, fetched once
                pl.BlockSpec((Cp, km + 8), lambda g: (0, 0)),
                pl.BlockSpec((Cp, km + 8), lambda g: (0, 0)),
            ],
            out_specs=pl.BlockSpec((1, Cp, L), lambda g: (g, 0, 0)),
        ),
        compiler_params=pltpu.CompilerParams(
            dimension_semantics=("parallel",),
            vmem_limit_bytes=32 * 1024 * 1024,   # explicit, safe on v5e/v6e/v7x
        ),
    )(x_lane, cmat, w1r, w2r)

    # Undo the lane-concat layout (layout plumbing, not compute), drop pad rows.
    out = out.reshape(G, Cp, B, HW).transpose(0, 2, 1, 3).reshape(Npad, Cp, HW)
    return out[:N, :Cout].reshape(N, Cout, H, W)


def _reference_forward(x_nchw, w1, b1, w2, b2):
    """Pure-JAX reference (lax.conv) for sanity checking."""
    dn = lax.conv_dimension_numbers(x_nchw.shape, w1.shape, ("NCHW", "HWIO", "NCHW"))
    y = lax.conv_general_dilated(x_nchw, w1, (1, 1), ((1, 1), (1, 1)),
                                 dimension_numbers=dn)
    y = y + b1[None, :, None, None]
    y = 0.5 * y * (1.0 + lax.erf(y * 0.7071067811865476))
    y = lax.conv_general_dilated(y, w2, (1, 1), ((1, 1), (1, 1)),
                                 dimension_numbers=dn)
    y = y + b2[None, :, None, None]
    return y + x_nchw


if __name__ == "__main__":
    # Small shapes consistent with ResBlock(in_channel=4, out_channel=4)
    N, C, H, W = 2, 4, 16, 16

    key = jax.random.PRNGKey(0)
    k_x, k_w1, k_b1, k_w2, k_b2 = jax.random.split(key, 5)

    x = jax.random.normal(k_x, (N, C, H, W), dtype=jnp.float32)
    # Deterministic synthetic parameters (HWIO layout).
    w1 = 0.1 * jax.random.normal(k_w1, (3, 3, C, C), dtype=jnp.float32)
    b1 = 0.1 * jax.random.normal(k_b1, (C,), dtype=jnp.float32)
    w2 = 0.1 * jax.random.normal(k_w2, (3, 3, C, C), dtype=jnp.float32)
    b2 = 0.1 * jax.random.normal(k_b2, (C,), dtype=jnp.float32)

    # One-time parameter repack (hoisted off the per-forward hot path).
    w1r, w2r = pack_resblock_params(w1, b1, w2, b2)

    out = resblock_forward(x, w1r, w2r)
    jax.block_until_ready(out)

    ref = _reference_forward(x, w1, b1, w2, b2)
    assert out.shape == (N, C, H, W)
    assert jnp.allclose(out, ref, atol=1e-4, rtol=1e-4), "mismatch vs reference (N=2)"

    # Also exercise the multi-image-per-step (B > 1) lane-concat path + batch pad.
    x5 = jax.random.normal(jax.random.PRNGKey(1), (5, C, H, W), dtype=jnp.float32)
    out5 = resblock_forward(x5, w1r, w2r)
    jax.block_until_ready(out5)
    ref5 = _reference_forward(x5, w1, b1, w2, b2)
    assert jnp.allclose(out5, ref5, atol=1e-4, rtol=1e-4), "mismatch vs reference (N=5)"

    print("KERNEL_OK")
</pallas_src>

<mosaic_0001>
module attributes {stable_mosaic.version = 11 : i64} {
  func.func @_resblock_kernel(%arg0: i32, %arg1: memref<1x8x256xf32, #tpu.memory_space<vmem>>, %arg2: memref<80x256xf32, #tpu.memory_space<vmem>>, %arg3: memref<8x80xf32, #tpu.memory_space<vmem>>, %arg4: memref<8x80xf32, #tpu.memory_space<vmem>>, %arg5: memref<1x8x256xf32, #tpu.memory_space<vmem>>) attributes {dimension_semantics = [#tpu.dimension_semantics<parallel>], iteration_bounds = array<i64: 2>, scalar_prefetch = 0 : i64, scratch_operands = 0 : i64, tpu.core_type = #tpu.core_type<tc>, window_params = [{transform_indices = @transform_0, window_bounds = array<i64: 1, 8, 256>}, {pipeline_mode = #tpu.pipeline_mode<synchronous>, transform_indices = @transform_1, window_bounds = array<i64: 80, 256>}, {pipeline_mode = #tpu.pipeline_mode<synchronous>, transform_indices = @transform_2, window_bounds = array<i64: 8, 80>}, {pipeline_mode = #tpu.pipeline_mode<synchronous>, transform_indices = @transform_3, window_bounds = array<i64: 8, 80>}, {transform_indices = @transform_4, window_bounds = array<i64: 1, 8, 256>}]} {
    %c0 = arith.constant 0 : index
    %c0_0 = arith.constant 0 : index
    %c0_1 = arith.constant 0 : index
    %0 = vector.load %arg1[%c0, %c0_0, %c0_1] : memref<1x8x256xf32, #tpu.memory_space<vmem>>, vector<1x8x256xf32>
    %1 = vector.shape_cast %0 : vector<1x8x256xf32> to vector<8x256xf32>
    %c0_2 = arith.constant 0 : index
    %c0_3 = arith.constant 0 : index
    %2 = vector.load %arg2[%c0_2, %c0_3] : memref<80x256xf32, #tpu.memory_space<vmem>>, vector<80x256xf32>
    %3 = vector.extract_strided_slice %2 {offsets = [0, 0], sizes = [72, 256], strides = [1, 1]} : vector<80x256xf32> to vector<72x256xf32>
    %4 = vector.extract_strided_slice %2 {offsets = [72, 0], sizes = [8, 256], strides = [1, 1]} : vector<80x256xf32> to vector<8x256xf32>
    %c17_i32 = arith.constant 17 : i32
    %5 = tpu.dynamic_rotate %1 by %c17_i32 dim 1 : vector<8x256xf32>, i32 -> vector<8x256xf32>
    %c16_i32 = arith.constant 16 : i32
    %6 = tpu.dynamic_rotate %1 by %c16_i32 dim 1 : vector<8x256xf32>, i32 -> vector<8x256xf32>
    %c15_i32 = arith.constant 15 : i32
    %7 = tpu.dynamic_rotate %1 by %c15_i32 dim 1 : vector<8x256xf32>, i32 -> vector<8x256xf32>
    %c1_i32 = arith.constant 1 : i32
    %8 = tpu.dynamic_rotate %1 by %c1_i32 dim 1 : vector<8x256xf32>, i32 -> vector<8x256xf32>
    %c255_i32 = arith.constant 255 : i32
    %9 = tpu.dynamic_rotate %1 by %c255_i32 dim 1 : vector<8x256xf32>, i32 -> vector<8x256xf32>
    %c241_i32 = arith.constant 241 : i32
    %10 = tpu.dynamic_rotate %1 by %c241_i32 dim 1 : vector<8x256xf32>, i32 -> vector<8x256xf32>
    %c240_i32 = arith.constant 240 : i32
    %11 = tpu.dynamic_rotate %1 by %c240_i32 dim 1 : vector<8x256xf32>, i32 -> vector<8x256xf32>
    %c239_i32 = arith.constant 239 : i32
    %12 = tpu.dynamic_rotate %1 by %c239_i32 dim 1 : vector<8x256xf32>, i32 -> vector<8x256xf32>
    %13 = tpu.concatenate %5, %6, %7, %8, %1, %9, %10, %11, %12 in 0 : vector<8x256xf32>, vector<8x256xf32>, vector<8x256xf32>, vector<8x256xf32>, vector<8x256xf32>, vector<8x256xf32>, vector<8x256xf32>, vector<8x256xf32>, vector<8x256xf32> -> vector<72x256xf32>
    %14 = arith.mulf %13, %3 : vector<72x256xf32>
    %15 = tpu.concatenate %14, %4 in 0 : vector<72x256xf32>, vector<8x256xf32> -> vector<80x256xf32>
    %c0_4 = arith.constant 0 : index
    %c0_5 = arith.constant 0 : index
    %16 = vector.load %arg3[%c0_4, %c0_5] : memref<8x80xf32, #tpu.memory_space<vmem>>, vector<8x80xf32>
    %cst = arith.constant dense<0.000000e+00> : vector<8x256xf32>
    %17 = tpu.matmul %16, %15, %cst {dimension_numbers = #tpu.dot_dimension_numbers<[1], [0], [0], [1], [0, 0, 1, 1], [], []>} : vector<8x80xf32>, vector<80x256xf32>, vector<8x256xf32> -> vector<8x256xf32>
    %cst_6 = arith.constant 5.000000e-01 : f32
    %18 = vector.broadcast %cst_6 : f32 to vector<8x256xf32>
    %19 = arith.mulf %18, %17 : vector<8x256xf32>
    %cst_7 = arith.constant 0.707106769 : f32
    %20 = vector.broadcast %cst_7 : f32 to vector<8x256xf32>
    %21 = arith.mulf %17, %20 : vector<8x256xf32>
    %22 = math.erf %21 : vector<8x256xf32>
    %cst_8 = arith.constant 1.000000e+00 : f32
    %23 = vector.broadcast %cst_8 : f32 to vector<8x256xf32>
    %24 = arith.addf %23, %22 : vector<8x256xf32>
    %25 = arith.mulf %19, %24 : vector<8x256xf32>
    %c17_i32_9 = arith.constant 17 : i32
    %26 = tpu.dynamic_rotate %25 by %c17_i32_9 dim 1 : vector<8x256xf32>, i32 -> vector<8x256xf32>
    %c16_i32_10 = arith.constant 16 : i32
    %27 = tpu.dynamic_rotate %25 by %c16_i32_10 dim 1 : vector<8x256xf32>, i32 -> vector<8x256xf32>
    %c15_i32_11 = arith.constant 15 : i32
    %28 = tpu.dynamic_rotate %25 by %c15_i32_11 dim 1 : vector<8x256xf32>, i32 -> vector<8x256xf32>
    %c1_i32_12 = arith.constant 1 : i32
    %29 = tpu.dynamic_rotate %25 by %c1_i32_12 dim 1 : vector<8x256xf32>, i32 -> vector<8x256xf32>
    %c255_i32_13 = arith.constant 255 : i32
    %30 = tpu.dynamic_rotate %25 by %c255_i32_13 dim 1 : vector<8x256xf32>, i32 -> vector<8x256xf32>
    %c241_i32_14 = arith.constant 241 : i32
    %31 = tpu.dynamic_rotate %25 by %c241_i32_14 dim 1 : vector<8x256xf32>, i32 -> vector<8x256xf32>
    %c240_i32_15 = arith.constant 240 : i32
    %32 = tpu.dynamic_rotate %25 by %c240_i32_15 dim 1 : vector<8x256xf32>, i32 -> vector<8x256xf32>
    %c239_i32_16 = arith.constant 239 : i32
    %33 = tpu.dynamic_rotate %25 by %c239_i32_16 dim 1 : vector<8x256xf32>, i32 -> vector<8x256xf32>
    %34 = tpu.concatenate %26, %27, %28, %29, %25, %30, %31, %32, %33 in 0 : vector<8x256xf32>, vector<8x256xf32>, vector<8x256xf32>, vector<8x256xf32>, vector<8x256xf32>, vector<8x256xf32>, vector<8x256xf32>, vector<8x256xf32>, vector<8x256xf32> -> vector<72x256xf32>
    %35 = arith.mulf %34, %3 : vector<72x256xf32>
    %36 = tpu.concatenate %35, %4 in 0 : vector<72x256xf32>, vector<8x256xf32> -> vector<80x256xf32>
    %c0_17 = arith.constant 0 : index
    %c0_18 = arith.constant 0 : index
    %37 = vector.load %arg4[%c0_17, %c0_18] : memref<8x80xf32, #tpu.memory_space<vmem>>, vector<8x80xf32>
    %cst_19 = arith.constant dense<0.000000e+00> : vector<8x256xf32>
    %38 = tpu.matmul %37, %36, %cst_19 {dimension_numbers = #tpu.dot_dimension_numbers<[1], [0], [0], [1], [0, 0, 1, 1], [], []>} : vector<8x80xf32>, vector<80x256xf32>, vector<8x256xf32> -> vector<8x256xf32>
    %39 = arith.addf %38, %1 : vector<8x256xf32>
    %c0_20 = arith.constant 0 : index
    %c0_21 = arith.constant 0 : index
    %c0_22 = arith.constant 0 : index
    %40 = vector.load %arg5[%c0_20, %c0_21, %c0_22] : memref<1x8x256xf32, #tpu.memory_space<vmem>>, vector<1x8x256xf32>
    %41 = vector.shape_cast %40 : vector<1x8x256xf32> to vector<8x256xf32>
    %42 = vector.shape_cast %39 : vector<8x256xf32> to vector<1x8x256xf32>
    tpu.vector_store %arg5[%c0_20, %c0_21, %c0_22], %42 {strides = array<i32>} : memref<1x8x256xf32, #tpu.memory_space<vmem>>, vector<1x8x256xf32>,
    return
  }
  func.func @transform_0(%arg0: i32) -> (i32, i32, i32) {
    %c0_i32 = arith.constant 0 : i32
    %c0_i32_0 = arith.constant 0 : i32
    %c0_i32_1 = arith.constant 0 : i32
    return %arg0, %c0_i32, %c0_i32_0 : i32, i32, i32
  }
  func.func @transform_1(%arg0: i32) -> (i32, i32) {
    %c0_i32 = arith.constant 0 : i32
    %c0_i32_0 = arith.constant 0 : i32
    %c0_i32_1 = arith.constant 0 : i32
    return %c0_i32, %c0_i32_0 : i32, i32
  }
  func.func @transform_2(%arg0: i32) -> (i32, i32) {
    %c0_i32 = arith.constant 0 : i32
    %c0_i32_0 = arith.constant 0 : i32
    %c0_i32_1 = arith.constant 0 : i32
    return %c0_i32, %c0_i32_0 : i32, i32
  }
  func.func @transform_3(%arg0: i32) -> (i32, i32) {
    %c0_i32 = arith.constant 0 : i32
    %c0_i32_0 = arith.constant 0 : i32
    %c0_i32_1 = arith.constant 0 : i32
    return %c0_i32, %c0_i32_0 : i32, i32
  }
  func.func @transform_4(%arg0: i32) -> (i32, i32, i32) {
    %c0_i32 = arith.constant 0 : i32
    %c0_i32_0 = arith.constant 0 : i32
    %c0_i32_1 = arith.constant 0 : i32
    return %arg0, %c0_i32, %c0_i32_0 : i32, i32, i32
  }
}

</mosaic_0001>

<bundles_post_ra>
// kernel: resblock_forward.1
= control target key start
LH: loop header
LB: loop body
LE: loop exit
PB: predicated region body
PF: predicated region fallthrough
CT: control target
= control target key end

     0   :  { %s698_s15 = smov 0   ;;  %s1000_s0 = inlined_call_operand.vmem [shape: f32[2,8,256], index: 0, kind: input, shape index: {}]   ;;  %s1001_s1 = inlined_call_operand.vmem [shape: f32[80,256], index: 1, kind: input, shape index: {}]   ;;  %s1002_s2 = inlined_call_operand.vmem [shape: f32[8,80], index: 2, kind: input, shape index: {}]   ;;  %s1003_s3 = inlined_call_operand.vmem [shape: f32[8,80], index: 3, kind: input, shape index: {}]   ;;  %s1004_s4 = inlined_call_operand.vmem [shape: f32[2,8,256], index: 4, kind: output, shape index: {}]  }
   0x1 LB: > { %s580_s16 = sadd.s32 4294967295, %s662_s15   ;;  %p584_p0 = scmp.ge.s32.totalorder %s662_s15, 1  ;;  %s662_s15 = sphi %s698_s15, %s14_s15  }
   0x2   : > { %p162_p1 = scmp.lt.s32.totalorder %s662_s15, 3 }
   0x4   : > { %p163_p2 = pnand %p584_p0, %p162_p1 }
   0x5   : > { %p188_p3 = scmp.lt.s32.totalorder (!%p163_p2), %s580_s16, 1  ;;  %s664_s21 = smov (!%p163_p2), 16   ;;  %v670_v2 = vmov (!%p163_p2), 0.0   ;;  %v224_v3 = vlaneseq (!%p163_p2)  ;;  %v755_v7 = vld [vmem:[%s1001_s1 + $0x10] sm:$0xff] (!%p163_p2)  ;;  %v762_v8 = vld [vmem:[%s1001_s1] sm:$0xff] (!%p163_p2)  ;;  %v767_v9 = vld [vmem:[%s1001_s1 + $0x8] sm:$0xff] (!%p163_p2) }
   0x6   : > { %166 = sbr.rel (%p163_p2) target bundleno = 767 (0x2ff), region = 36  ;;  %s665_s22 = smov (!%p163_p2), 17   ;;  %365 = vmatprep.mubr.f32.mxu0 (!%p163_p2), %v670_v2  ;;  %516 = vmatprep.mubr.f32.mxu1 (!%p163_p2), %v670_v2  ;;  %v772_v10 = vld [vmem:[%s1001_s1 + $0x18] sm:$0xff] (!%p163_p2)  ;;  %v790_v25 = vld [vmem:[%s1001_s1 + $0x20] sm:$0xff] (!%p163_p2)  ;;  %v796_v26 = vld [vmem:[%s1001_s1 + $0x28] sm:$0xff] (!%p163_p2)  ;;  %vm297_vm8 = vcmask (!%p163_p2), 654336  }
   0x7   : > { %s666_s23 = smov (!%p163_p2), 15   ;;  %s667_s24 = smov (!%p163_p2), 1   ;;  %v750_v4 = vand.u32 (!%p163_p2), 127, %v224_v3  ;;  %v805_v29 = vld [vmem:[%s1001_s1 + $0x30] sm:$0xff] (!%p163_p2)  ;;  %v810_v30 = vld [vmem:[%s1001_s1 + $0x38] sm:$0xff] (!%p163_p2)  ;;  %v820_v35 = vld [vmem:[%s1001_s1 + $0x48] sm:$0xff] (!%p163_p2) }
   0x8   : > { %s668_s25 = smov (!%p163_p2), 127   ;;  %s669_s26 = smov (!%p163_p2), 113   ;;  %v825_v36 = vld [vmem:[%s1001_s1 + $0x40] sm:$0xff] (!%p163_p2)  ;;  %v834_v41 = vld [vmem:[%s1001_s1 + $0x50] sm:$0xff] (!%p163_p2)  ;;  %v839_v42 = vld [vmem:[%s1001_s1 + $0x58] sm:$0xff] (!%p163_p2) }
   0x9   : > { %s671_s27 = smov (!%p163_p2), 112   ;;  %s672_s28 = smov (!%p163_p2), 111   ;;  %vm233_vm0 = vcmp.lt.s32.totalorder (!%p163_p2), %v750_v4, 16  ;;  %vm226_vm1 = vcmp.lt.s32.totalorder (!%p163_p2), %v750_v4, 17  ;;  %vm240_vm2 = vcmp.lt.s32.totalorder (!%p163_p2), %v750_v4, 15  ;;  %vm247_vm3 = vcmp.lt.s32.totalorder (!%p163_p2), %v750_v4, 1 }
   0xa   : > { %vm254_vm4 = vcmp.lt.s32.totalorder (!%p163_p2), %v750_v4, 127  ;;  %vm261_vm5 = vcmp.lt.s32.totalorder (!%p163_p2), %v750_v4, 113  ;;  %v855_v57 = vld [vmem:[%s1001_s1 + $0x60] sm:$0xff] (!%p163_p2)  ;;  %vm268_vm6 = vcmp.lt.s32.totalorder (!%p163_p2), %v750_v4, 112  ;;  %v861_v58 = vld [vmem:[%s1001_s1 + $0x68] sm:$0xff] (!%p163_p2)  ;;  %v870_v61 = vld [vmem:[%s1001_s1 + $0x70] sm:$0xff] (!%p163_p2) }
   0xb   : > { %v875_v62 = vld [vmem:[%s1001_s1 + $0x78] sm:$0xff] (!%p163_p2)  ;;  %vm275_vm7 = vcmp.lt.s32.totalorder (!%p163_p2), %v750_v4, 111 }
   0xd   : > { %s1006_s16 = smov (!%p188_p3, %s580_s16), 1 }
   0xe   : > { %s593_s17 = sshll.u32 %s1006_s16, 4 }
   0xf   : > { %s192_s20 = scalar_lea.vmem %s1000_s0, %s593_s17 }
  0x10   : > { %v714_v0 = vld [vmem:[%s192_s20] sm:$0xff]  ;;  %v720_v1 = vld [vmem:[%s192_s20 + $0x8] sm:$0xff] }
  0x11   : > { %229 = vrot.lane.b32.xlu1 %v714_v0, %s664_s21  ;;  %220 = vrot.lane.b32.xlu0 %v714_v0, %s665_s22  ;;  %v287_v47 = vmul.f32 %v820_v35, %v720_v1  ;;  %v286_v48 = vmul.f32 %v825_v36, %v714_v0 }
  0x15   : > { %231 = vrot.lane.b32.xlu1 %v720_v1, %s664_s21  ;;  %222 = vrot.lane.b32.xlu0 %v720_v1, %s665_s22 }
  0x19   : > { %238 = vrot.lane.b32.xlu1 %v720_v1, %s666_s23  ;;  %236 = vrot.lane.b32.xlu0 %v714_v0, %s666_s23 }
  0x1d   : > { %245 = vrot.lane.b32.xlu1 %v720_v1, %s667_s24  ;;  %243 = vrot.lane.b32.xlu0 %v714_v0, %s667_s24 }
  0x21   : > { %252 = vrot.lane.b32.xlu1 %v720_v1, %s668_s25  ;;  %250 = vrot.lane.b32.xlu0 %v714_v0, %s668_s25 }
  0x25   : > { %259 = vrot.lane.b32.xlu1 %v720_v1, %s669_s26  ;;  %257 = vrot.lane.b32.xlu0 %v714_v0, %s669_s26 }
  0x29   : > { %266 = vrot.lane.b32.xlu1 %v720_v1, %s671_s27  ;;  %264 = vrot.lane.b32.xlu0 %v714_v0, %s671_s27 }
  0x2d   : > { %273 = vrot.lane.b32.xlu1 %v720_v1, %s672_s28  ;;  %271 = vrot.lane.b32.xlu0 %v714_v0, %s672_s28 }
  0x83   : > { %v230_v5 = vpop.permute.xlu1 %229  ;;  %v221_v6 = vpop.permute.xlu0 %220 }
  0x87   : > { %v232_v11 = vpop.permute.xlu1 %231  ;;  %v223_v12 = vpop.permute.xlu0 %222 }
  0x88   : > { %v234_v13 = vsel %vm233_vm0, %v230_v5, %v232_v11  ;;  %v235_v14 = vsel %vm233_vm0, %v232_v11, %v230_v5  ;;  %v227_v15 = vsel %vm226_vm1, %v221_v6, %v223_v12  ;;  %v228_v16 = vsel %vm226_vm1, %v223_v12, %v221_v6 }
  0x89   : > { %v280_v17 = vmul.f32 %v235_v14, %v755_v7  ;;  %v278_v18 = vmul.f32 %v228_v16, %v762_v8  ;;  %v279_v19 = vmul.f32 %v227_v15, %v767_v9  ;;  %v281_v20 = vmul.f32 %v234_v13, %v772_v10  ;;  %v889_v14 = vld [vmem:[%s1001_s1 + $0x80] sm:$0xff]  ;;  %v894_v15 = vld [vmem:[%s1001_s1 + $0x88] sm:$0xff] }
  0x8b   : > { %v239_v21 = vpop.permute.xlu1 %238  ;;  %v237_v22 = vpop.permute.xlu0 %236  ;;  %v595_v23 = vpack.c.bf16 %v281_v20, %v279_v19  ;;  %v597_v24 = vpack.c.bf16 %v280_v17, %v278_v18 }
  0x8c   : > { %v241_v27 = vsel %vm240_vm2, %v237_v22, %v239_v21  ;;  %v242_v28 = vsel %vm240_vm2, %v239_v21, %v237_v22  ;;  %v903_v22 = vld [vmem:[%s1001_s1 + $0x98] sm:$0xff] }
  0x8d   : > { %596 = vmatprep.subr.bf16.mxu0 %v595_v23  ;;  %v282_v37 = vmul.f32 %v242_v28, %v790_v25  ;;  %v283_v38 = vmul.f32 %v241_v27, %v796_v26  ;;  %v908_v23 = vld [vmem:[%s1001_s1 + $0x90] sm:$0xff] }
  0x8e   : > { %598 = vmatpush1.bf16.msra.mxu0 %v597_v24 }
  0x8f   : > { %v246_v31 = vpop.permute.xlu1 %245  ;;  %v244_v32 = vpop.permute.xlu0 %243 }
  0x90   : > { %v248_v33 = vsel %vm247_vm3, %v244_v32, %v246_v31  ;;  %v249_v34 = vsel %vm247_vm3, %v246_v31, %v244_v32  ;;  %v296_v32 = vld [vmem:[%s1002_s2] sm:$0xff] }
  0x91   : > { %v284_v39 = vmul.f32 %v249_v34, %v805_v29  ;;  %v285_v40 = vmul.f32 %v248_v33, %v810_v30 }
  0x93   : > { %v253_v43 = vpop.permute.xlu1 %252  ;;  %v251_v44 = vpop.permute.xlu0 %250  ;;  %v599_v45 = vpack.c.bf16 %v285_v40, %v283_v38  ;;  %v601_v46 = vpack.c.bf16 %v284_v39, %v282_v37 }
  0x94   : > { %v255_v49 = vsel %vm254_vm4, %v251_v44, %v253_v43  ;;  %v256_v50 = vsel %vm254_vm4, %v253_v43, %v251_v44 }
  0x95   : > { %v288_v51 = vmul.f32 %v255_v49, %v834_v41  ;;  %v289_v52 = vmul.f32 %v256_v50, %v839_v42  ;;  %600 = vmatprep.subr.bf16.mxu0 %v599_v45 }
  0x96   : > { %602 = vmatpush1.bf16.msra.mxu0 %v601_v46 }
  0x97   : > { %v260_v53 = vpop.permute.xlu1 %259  ;;  %v258_v54 = vpop.permute.xlu0 %257  ;;  %v603_v55 = vpack.c.bf16 %v289_v52, %v287_v47  ;;  %v605_v56 = vpack.c.bf16 %v288_v51, %v286_v48 }
  0x98   : > { %v262_v59 = vsel %vm261_vm5, %v258_v54, %v260_v53  ;;  %v263_v60 = vsel %vm261_vm5, %v260_v53, %v258_v54 }
  0x99   : > { %604 = vmatprep.subr.bf16.mxu0 %v603_v55  ;;  %v290_v6 = vmul.f32 %v262_v59, %v855_v57  ;;  %v291_v11 = vmul.f32 %v263_v60, %v861_v58 }
  0x9a   : > { %606 = vmatpush1.bf16.msra.mxu0 %v605_v56 }
  0x9b   : > { %v267_v63 = vpop.permute.xlu1 %266  ;;  %v265_v2 = vpop.permute.xlu0 %264 }
  0x9c   : > { %v269_v3 = vsel %vm268_vm6, %v265_v2, %v267_v63  ;;  %v270_v5 = vsel %vm268_vm6, %v267_v63, %v265_v2 }
  0x9d   : > { %v292_v12 = vmul.f32 %v269_v3, %v870_v61  ;;  %v293_v13 = vmul.f32 %v270_v5, %v875_v62 }
  0x9f   : > { %v274_v16 = vpop.permute.xlu1 %273  ;;  %v272_v17 = vpop.permute.xlu0 %271  ;;  %v607_v18 = vpack.c.bf16 %v293_v13, %v291_v11  ;;  %v609_v19 = vpack.c.bf16 %v292_v12, %v290_v6 }
  0xa0   : > { %v276_v20 = vsel %vm275_vm7, %v272_v17, %v274_v16  ;;  %v277_v21 = vsel %vm275_vm7, %v274_v16, %v272_v17 }
  0xa1   : > { %v294_v24 = vmul.f32 %v276_v20, %v889_v14  ;;  %v295_v27 = vmul.f32 %v277_v21, %v894_v15  ;;  %608 = vmatprep.subr.bf16.mxu0 %v607_v18 }
  0xa2   : > { %610 = vmatpush1.bf16.msra.mxu0 %v609_v19 }
  0xa3   : > { %v611_v28 = vpack.c.bf16 %v903_v22, %v295_v27  ;;  %v613_v31 = vpack.c.bf16 %v908_v23, %v294_v24 }
  0xa5   : > { %612 = vmatprep.subr.bf16.mxu0 %v611_v28 }
  0xa6   : > { %614 = vmatpush1.bf16.msra.mxu0 %v613_v31 }
  0xa9   : > { %589 = vmatmul.mubr.msk.f32.vlgmr.msra.gmra.mrb[0].mxu0 %vm297_vm8, %v296_v32 }
 0x17c   : > { %v367_v33 = vpop.f32.mrb[0].mxu0 }
 0x17d   : > { %v374_v34 = vmul.f32 0.70710677, %v367_v33  ;;  %v369_v37 = vpop.f32.mrb[1].mxu0  ;;  %v372_v43 = vmul.f32 0.5, %v367_v33 }
 0x17e   : > { %v375_v38 = vmul.f32 0.70710677, %v369_v37  ;;  %v373_v45 = vmul.f32 0.5, %v369_v37 }
 0x17f   : > { %652 = verf.f32 %v374_v34 }
 0x180   : > { %654 = verf.f32 %v375_v38 }
 0x189   : > { %v653_v39 = vpop.eup %652 }
 0x18a   : > { %v655_v40 = vpop.eup %654  ;;  %v378_v44 = vadd.f32 1.0, %v653_v39 }
 0x18b   : > { %v379_v46 = vadd.f32 1.0, %v655_v40 }
 0x18c   : > { %v380_v47 = vmul.f32 %v378_v44, %v372_v43 }
 0x18d   : > { %v381_v48 = vmul.f32 %v379_v46, %v373_v45 }
 0x18e   : > { %382 = vrot.lane.b32.xlu0 %v380_v47, %s665_s22 }
 0x18f   : > { %384 = vrot.lane.b32.xlu1 %v381_v48, %s665_s22 }
 0x192   : > { %388 = vrot.lane.b32.xlu0 %v380_v47, %s664_s21 }
 0x193   : > { %390 = vrot.lane.b32.xlu1 %v381_v48, %s664_s21 }
 0x196   : > { %394 = vrot.lane.b32.xlu0 %v380_v47, %s666_s23 }
 0x197   : > { %396 = vrot.lane.b32.xlu1 %v381_v48, %s666_s23 }
 0x19a   : > { %400 = vrot.lane.b32.xlu0 %v380_v47, %s667_s24 }
 0x19b   : > { %402 = vrot.lane.b32.xlu1 %v381_v48, %s667_s24 }
 0x19e   : > { %406 = vrot.lane.b32.xlu0 %v380_v47, %s668_s25 }
 0x19f   : > { %408 = vrot.lane.b32.xlu1 %v381_v48, %s668_s25  ;;  %s197_s25 = scalar_lea.vmem %s1004_s4, %s593_s17 }
 0x1a2   : > { %412 = vrot.lane.b32.xlu0 %v380_v47, %s669_s26 }
 0x1a3   : > { %414 = vrot.lane.b32.xlu1 %v381_v48, %s669_s26 }
 0x1a6   : > { %418 = vrot.lane.b32.xlu0 %v380_v47, %s671_s27 }
 0x1a7   : > { %420 = vrot.lane.b32.xlu1 %v381_v48, %s671_s27 }
 0x1aa   : > { %424 = vrot.lane.b32.xlu0 %v380_v47, %s672_s28 }
 0x1ab   : > { %426 = vrot.lane.b32.xlu1 %v381_v48, %s672_s28 }
 0x200   : > { %v383_v49 = vpop.permute.xlu0 %382 }
 0x201   : > { %v385_v50 = vpop.permute.xlu1 %384 }
 0x202   : > { %v386_v51 = vsel %vm226_vm1, %v383_v49, %v385_v50  ;;  %v387_v52 = vsel %vm226_vm1, %v385_v50, %v383_v49 }
 0x203   : > { %v430_v59 = vmul.f32 %v387_v52, %v762_v8  ;;  %v431_v63 = vmul.f32 %v386_v51, %v767_v9 }
 0x204   : > { %v389_v53 = vpop.permute.xlu0 %388 }
 0x205   : > { %v391_v54 = vpop.permute.xlu1 %390 }
 0x206   : > { %v392_v55 = vsel %vm233_vm0, %v389_v53, %v391_v54  ;;  %v393_v56 = vsel %vm233_vm0, %v391_v54, %v389_v53 }
 0x207   : > { %v432_v60 = vmul.f32 %v393_v56, %v755_v7  ;;  %v433_v2 = vmul.f32 %v392_v55, %v772_v10 }
 0x208   : > { %v395_v3 = vpop.permute.xlu0 %394 }
 0x209   : > { %v397_v5 = vpop.permute.xlu1 %396  ;;  %v615_v6 = vpack.c.bf16 %v433_v2, %v431_v63  ;;  %v617_v11 = vpack.c.bf16 %v432_v60, %v430_v59 }
 0x20a   : > { %v398_v12 = vsel %vm240_vm2, %v395_v3, %v397_v5  ;;  %v399_v13 = vsel %vm240_vm2, %v397_v5, %v395_v3 }
 0x20b   : > { %616 = vmatprep.subr.bf16.mxu1 %v615_v6  ;;  %v434_v10 = vmul.f32 %v399_v13, %v790_v25  ;;  %v435_v17 = vmul.f32 %v398_v12, %v796_v26  ;;  %v439_v26 = vmul.f32 %v381_v48, %v820_v35 }
 0x20c   : > { %v401_v16 = vpop.permute.xlu0 %400  ;;  %618 = vmatpush1.bf16.msra.mxu1 %v617_v11 }
 0x20d   : > { %v403_v8 = vpop.permute.xlu1 %402 }
 0x20e   : > { %v404_v7 = vsel %vm247_vm3, %v401_v16, %v403_v8  ;;  %v405_v9 = vsel %vm247_vm3, %v403_v8, %v401_v16 }
 0x20f   : > { %v436_v18 = vmul.f32 %v405_v9, %v805_v29  ;;  %v437_v19 = vmul.f32 %v404_v7, %v810_v30  ;;  %v438_v29 = vmul.f32 %v380_v47, %v825_v36 }
 0x210   : > { %v407_v20 = vpop.permute.xlu0 %406 }
 0x211   : > { %v409_v21 = vpop.permute.xlu1 %408  ;;  %v619_v24 = vpack.c.bf16 %v437_v19, %v435_v17  ;;  %v621_v27 = vpack.c.bf16 %v436_v18, %v434_v10 }
 0x212   : > { %v410_v28 = vsel %vm254_vm4, %v407_v20, %v409_v21  ;;  %v411_v31 = vsel %vm254_vm4, %v409_v21, %v407_v20 }
 0x213   : > { %v440_v32 = vmul.f32 %v410_v28, %v834_v41  ;;  %v441_v25 = vmul.f32 %v411_v31, %v839_v42  ;;  %620 = vmatprep.subr.bf16.mxu1 %v619_v24 }
 0x214   : > { %v413_v30 = vpop.permute.xlu0 %412  ;;  %622 = vmatpush1.bf16.msra.mxu1 %v621_v27 }
 0x215   : > { %v415_v33 = vpop.permute.xlu1 %414  ;;  %v623_v34 = vpack.c.bf16 %v441_v25, %v439_v26  ;;  %v625_v37 = vpack.c.bf16 %v440_v32, %v438_v29 }
 0x216   : > { %v416_v38 = vsel %vm261_vm5, %v413_v30, %v415_v33  ;;  %v417_v39 = vsel %vm261_vm5, %v415_v33, %v413_v30 }
 0x217   : > { %624 = vmatprep.subr.bf16.mxu1 %v623_v34  ;;  %v442_v40 = vmul.f32 %v416_v38, %v855_v57  ;;  %v443_v43 = vmul.f32 %v417_v39, %v861_v58 }
 0x218   : > { %v419_v41 = vpop.permute.xlu0 %418  ;;  %626 = vmatpush1.bf16.msra.mxu1 %v625_v37 }
 0x219   : > { %v421_v42 = vpop.permute.xlu1 %420 }
 0x21a   : > { %v422_v35 = vsel %vm268_vm6, %v419_v41, %v421_v42  ;;  %v423_v36 = vsel %vm268_vm6, %v421_v42, %v419_v41 }
 0x21b   : > { %v444_v44 = vmul.f32 %v422_v35, %v870_v61  ;;  %v445_v45 = vmul.f32 %v423_v36, %v875_v62  ;;  %v448_v62 = vld [vmem:[%s1003_s3] sm:$0xff] }
 0x21c   : > { %v425_v46 = vpop.permute.xlu0 %424 }
 0x21d   : > { %v427_v47 = vpop.permute.xlu1 %426  ;;  %v627_v48 = vpack.c.bf16 %v445_v45, %v443_v43  ;;  %v629_v49 = vpack.c.bf16 %v444_v44, %v442_v40 }
 0x21e   : > { %v428_v50 = vsel %vm275_vm7, %v425_v46, %v427_v47  ;;  %v429_v51 = vsel %vm275_vm7, %v427_v47, %v425_v46 }
 0x21f   : > { %v446_v52 = vmul.f32 %v428_v50, %v889_v14  ;;  %v447_v57 = vmul.f32 %v429_v51, %v894_v15  ;;  %628 = vmatprep.subr.bf16.mxu1 %v627_v48 }
 0x220   : > { %630 = vmatpush1.bf16.msra.mxu1 %v629_v49 }
 0x221   : > { %v631_v58 = vpack.c.bf16 %v903_v22, %v447_v57  ;;  %v633_v61 = vpack.c.bf16 %v908_v23, %v446_v52 }
 0x223   : > { %632 = vmatprep.subr.bf16.mxu1 %v631_v58 }
 0x224   : > { %634 = vmatpush1.bf16.msra.mxu1 %v633_v61 }
 0x227   : > { %590 = vmatmul.mubr.msk.f32.vlgmr.msra.gmra.mrb[0].mxu1 %vm297_vm8, %v448_v62 }
 0x2fa   : > { %v518_v4 = vpop.f32.mrb[0].mxu1 }
 0x2fb   : > { %v519_v14 = vadd.f32 %v518_v4, %v714_v0  ;;  %v520_v15 = vpop.f32.mrb[1].mxu1 }
 0x2fc   : > { %v521_v22 = vadd.f32 %v520_v15, %v720_v1 }
 0x2fd   : > { %523 = vst [vmem:[%s197_s25] sm:$0xff] %v519_v14 }
 0x2fe   : > { %524 = vst [vmem:[%s197_s25 + $0x8] sm:$0xff] %v521_v22 }
 0x2ff PF: > { %s14_s15 = sadd.s32 1, %s662_s15  }
 0x300   : > { %p11_p4 = scmp.ge.s32.totalorder %s14_s15, 4  }
 0x302   :  { %13 = sbr.rel (!%p11_p4) target bundleno = 1 (0x1), region = 66 }

</bundles_post_ra>
